<compile_context>
chip_gen: v7x
topology: tpu7x:2x2x1
jax: 0.10.0
libtpu: 0.0.40
codegen_flags: <defaults>
</compile_context>

<pallas_src>
import functools
import math

import numpy as np

import jax
import jax.numpy as jnp
from jax.experimental import pallas as pl
from jax.experimental.pallas import tpu as pltpu


# ----------------------------------------------------------------------------
# Static lane-permutation constants (computed in numpy, embedded as constants).
# Within a 1152-lane group row: matrix m occupies lanes [9m, 9m+9).
# diag elements are flat cols (0, 4, 8); offdiag are (1, 5, 6).
# Output lane l = 3m + j of a 384-wide slab pulls input lane 3l + (l % 3) for
# diag and 3l + ((l + 1) % 3) for offdiag, which always falls inside the
# 384-lane source window [384v, 384(v+1)) for output vreg v.
# ----------------------------------------------------------------------------
def _make_dense_lane_consts():
    u = np.arange(128)
    consts = []
    for v in range(3):
        l = 128 * v + u
        lam_d = 3 * u + (l % 3)          # window-local source lane for diag
        lam_o = 3 * u + ((l + 1) % 3)    # window-local source lane for offdiag
        consts.append((lam_d, lam_o))
    return consts


_DENSE_LANE_CONSTS = _make_dense_lane_consts()
_TRACE_MOD3 = (np.arange(384) % 3).astype(np.int32)


# ----------------------------------------------------------------------------
# Dense (lane-packed) kernel: x block (bng, 1152) -> diag/off blocks (bng, 384)
# ----------------------------------------------------------------------------
def _split_dense_kernel(x_ref, diag_ref, off_ref, *, traceless):
    x = x_ref[...]                    # (bng, 1152), lane-dense
    bng = x.shape[0]

    def _const_row(np_row):
        return jnp.broadcast_to(
            jnp.asarray(np_row, jnp.int32)[None, :], (bng, 128))

    def gather384(window, lam_np):
        # window: (bng, 384); lam_np: static (128,) indices in [0, 384).
        s0 = window[:, 0:128]
        s1 = window[:, 128:256]
        s2 = window[:, 256:384]
        lam = _const_row(lam_np)
        i0 = _const_row(np.clip(lam_np, 0, 127))
        i1 = _const_row(np.clip(lam_np - 128, 0, 127))
        i2 = _const_row(np.clip(lam_np - 256, 0, 127))
        g0 = jnp.take_along_axis(s0, i0, axis=1)
        g1 = jnp.take_along_axis(s1, i1, axis=1)
        g2 = jnp.take_along_axis(s2, i2, axis=1)
        return jnp.where(lam < 128, g0, jnp.where(lam < 256, g1, g2))

    d_parts, o_parts = [], []
    for v in range(3):
        lam_d, lam_o = _DENSE_LANE_CONSTS[v]
        w = x[:, 384 * v:384 * (v + 1)]
        d_parts.append(gather384(w, lam_d))
        o_parts.append(gather384(w, lam_o))

    diag = jnp.concatenate(d_parts, axis=-1)   # (bng, 384), per-matrix (d0,d1,d2)
    off = jnp.concatenate(o_parts, axis=-1)    # (bng, 384), per-matrix (o0,o1,o2)

    if traceless:
        d32 = diag.astype(jnp.float32)
        # roll(x, s)[i] = x[(i - s) mod 384]; positive shifts only.
        dp1 = pltpu.roll(d32, 1, axis=1)       # D[l-1]
        dp2 = pltpu.roll(d32, 2, axis=1)       # D[l-2]
        dm1 = pltpu.roll(d32, 383, axis=1)     # D[l+1]
        dm2 = pltpu.roll(d32, 382, axis=1)     # D[l+2]
        r = jnp.broadcast_to(jnp.asarray(_TRACE_MOD3)[None, :], d32.shape)
        trace = jnp.where(r == 0, d32 + dm1 + dm2,
                          jnp.where(r == 1, dp1 + d32 + dm1,
                                    dp2 + dp1 + d32))
        diag = d32 - trace * jnp.float32(1.0 / 3.0)

    diag_ref[...] = diag.astype(diag_ref.dtype)
    off_ref[...] = off.astype(off_ref.dtype)


def _call_dense(xg, traceless, out_dtype):
    G = xg.shape[0]
    # Target ~8 grid steps (v7x 2-TC balance) with a cap keeping VMEM small.
    if G <= 8:
        bng = G
    else:
        bng = min(256, ((pl.cdiv(G, 8) + 7) // 8) * 8)
        bng = min(bng, G)
    grid = pl.cdiv(G, bng)
    kernel = functools.partial(_split_dense_kernel, traceless=traceless)
    return pl.pallas_call(
        kernel,
        out_shape=(jax.ShapeDtypeStruct((G, 384), out_dtype),
                   jax.ShapeDtypeStruct((G, 384), out_dtype)),
        grid_spec=pltpu.PrefetchScalarGridSpec(
            num_scalar_prefetch=0,
            grid=(grid,),
            in_specs=[pl.BlockSpec((bng, 1152), lambda i: (i, 0))],
            out_specs=(pl.BlockSpec((bng, 384), lambda i: (i, 0)),
                       pl.BlockSpec((bng, 384), lambda i: (i, 0)))),
        compiler_params=pltpu.CompilerParams(
            dimension_semantics=("parallel",)),
    )(xg)


# ----------------------------------------------------------------------------
# Safe fallback kernel: x block (bn, 9) -> combined (bn, 6) = [diag | offdiag]
# ----------------------------------------------------------------------------
def _split_safe_kernel(x_ref, out_ref, *, traceless):
    x = x_ref[...]                                   # (bn, 9)
    d0, d1, d2 = x[:, 0:1], x[:, 4:5], x[:, 8:9]
    off = jnp.concatenate([x[:, 1:2], x[:, 5:6], x[:, 6:7]], axis=-1)
    if traceless:
        f0 = d0.astype(jnp.float32)
        f1 = d1.astype(jnp.float32)
        f2 = d2.astype(jnp.float32)
        m = (f0 + f1 + f2) * jnp.float32(1.0 / 3.0)
        diag = jnp.concatenate([f0 - m, f1 - m, f2 - m], axis=-1)
    else:
        diag = jnp.concatenate([d0, d1, d2], axis=-1)
    out_ref[...] = jnp.concatenate(
        [diag.astype(out_ref.dtype), off.astype(out_ref.dtype)], axis=-1)


def _call_safe(x2, traceless):
    n = x2.shape[0]
    if n <= 8:
        bn = n
    else:
        bn = min(2048, ((pl.cdiv(n, 8) + 7) // 8) * 8)
        bn = min(bn, n)
    grid = pl.cdiv(n, bn)
    kernel = functools.partial(_split_safe_kernel, traceless=traceless)
    y = pl.pallas_call(
        kernel,
        out_shape=jax.ShapeDtypeStruct((n, 6), x2.dtype),
        grid_spec=pltpu.PrefetchScalarGridSpec(
            num_scalar_prefetch=0,
            grid=(grid,),
            in_specs=[pl.BlockSpec((bn, 9), lambda i: (i, 0))],
            out_specs=pl.BlockSpec((bn, 6), lambda i: (i, 0))),
        compiler_params=pltpu.CompilerParams(
            dimension_semantics=("parallel",)),
    )(x2)
    return y[:, 0:3], y[:, 3:6]


# ----------------------------------------------------------------------------
# Reference + dense-path feature probe
# ----------------------------------------------------------------------------
def _reference(x, traceless):
    diag = jnp.stack([x[..., 0, 0], x[..., 1, 1], x[..., 2, 2]], axis=-1)
    offdiag = jnp.stack([x[..., 0, 1], x[..., 1, 2], x[..., 2, 0]], axis=-1)
    if traceless:
        diag = diag - jnp.mean(diag, axis=-1, keepdims=True)
    return diag, offdiag


_DENSE_OK = {}


def _dense_path_supported(dtype, traceless):
    """One-time per (dtype, traceless) probe: lane-gather lowering + semantics."""
    key = (jnp.dtype(dtype), bool(traceless))
    ok = _DENSE_OK.get(key)
    if ok is None:
        try:
            n = 1024
            xp = jax.random.normal(jax.random.PRNGKey(17), (n, 3, 3),
                                   dtype=jnp.float32).astype(dtype)
            dg, og = _call_dense(xp.reshape(n // 128, 1152), traceless,
                                 jnp.dtype(dtype))
            jax.block_until_ready((dg, og))
            rd, ro = _reference(xp, traceless)
            tol = 1e-5 if jnp.dtype(dtype) == jnp.dtype(jnp.float32) else 5e-2
            ok = (bool(jnp.allclose(dg.reshape(n, 3).astype(jnp.float32),
                                    rd.astype(jnp.float32), atol=tol, rtol=tol))
                  and bool(jnp.allclose(og.reshape(n, 3).astype(jnp.float32),
                                        ro.astype(jnp.float32), atol=tol,
                                        rtol=tol)))
        except Exception:
            ok = False
        _DENSE_OK[key] = ok
    return ok


# ----------------------------------------------------------------------------
# Public wrapper (== SplitMatrix.forward)
# ----------------------------------------------------------------------------
def split_matrix(x, traceless=False):
    """JAX/Pallas equivalent of SplitMatrix.forward.

    x: array of shape (..., 3, 3)
    returns: (diag, offdiag), each of shape (..., 3)
    """
    assert x.shape[-1] == 3 and x.shape[-2] == 3, "expected (..., 3, 3) input"
    batch_shape = x.shape[:-2]
    n = math.prod(batch_shape) if batch_shape else 1

    if n == 0:
        z = jnp.zeros(batch_shape + (3,), x.dtype)
        return z, z

    x2 = x.reshape(n, 9)

    use_dense = (n % 128 == 0 and n >= 1024
                 and _dense_path_supported(x.dtype, traceless))

    if use_dense:
        G = n // 128
        diag_g, off_g = _call_dense(x2.reshape(G, 1152), traceless, x.dtype)
        diag = diag_g.reshape(n, 3)      # free row-major reshape back to (n, 3)
        off = off_g.reshape(n, 3)
    else:
        # TODO(synk): ragged n (n % 128 != 0) falls back to the strided-DMA
        # layout; a main+tail split would keep the dense path for the bulk rows.
        diag, off = _call_safe(x2, traceless)

    return diag.reshape(*batch_shape, 3), off.reshape(*batch_shape, 3)


if __name__ == "__main__":
    key = jax.random.PRNGKey(0)
    k1, k2, k3 = jax.random.split(key, 3)

    # Small batch (n = 128): safe path.
    x_small = jax.random.normal(k1, (2, 4, 16, 3, 3), dtype=jnp.float32)
    # Medium batch (n = 1024, multiple of 128): dense lane-packed path.
    x_med = jax.random.normal(k2, (2, 512, 3, 3), dtype=jnp.float32)
    # Ragged batch (n = 9000): safe fallback path with a multi-step grid.
    x_big = jax.random.normal(k3, (3, 3000, 3, 3), dtype=jnp.float32)

    ok = True
    for x in (x_small, x_med, x_big):
        for traceless in (False, True):
            diag, offdiag = split_matrix(x, traceless=traceless)
            jax.block_until_ready((diag, offdiag))
            ref_diag, ref_off = _reference(x, traceless)
            ok &= bool(jnp.allclose(diag, ref_diag, atol=1e-5))
            ok &= bool(jnp.allclose(offdiag, ref_off, atol=1e-5))
            ok &= diag.shape == x.shape[:-2] + (3,)
            ok &= offdiag.shape == x.shape[:-2] + (3,)

    if ok:
        print("KERNEL_OK")
    else:
        raise SystemExit("mismatch vs reference")
</pallas_src>

<mosaic_0001>
module attributes {stable_mosaic.version = 11 : i64} {
  func.func @_split_safe_kernel(%arg0: i32, %arg1: memref<16x9xf32, #tpu.memory_space<vmem>>, %arg2: memref<16x6xf32, #tpu.memory_space<vmem>>) attributes {dimension_semantics = [#tpu.dimension_semantics<parallel>], iteration_bounds = array<i64: 8>, scalar_prefetch = 0 : i64, scratch_operands = 0 : i64, tpu.core_type = #tpu.core_type<tc>, window_params = [{transform_indices = @transform_0, window_bounds = array<i64: 16, 9>}, {transform_indices = @transform_1, window_bounds = array<i64: 16, 6>}]} {
    %c0 = arith.constant 0 : index
    %c0_0 = arith.constant 0 : index
    %0 = vector.load %arg1[%c0, %c0_0] : memref<16x9xf32, #tpu.memory_space<vmem>>, vector<16x9xf32>
    %1 = vector.extract_strided_slice %0 {offsets = [0, 0], sizes = [16, 1], strides = [1, 1]} : vector<16x9xf32> to vector<16x1xf32>
    %2 = vector.extract_strided_slice %0 {offsets = [0, 4], sizes = [16, 1], strides = [1, 1]} : vector<16x9xf32> to vector<16x1xf32>
    %3 = vector.extract_strided_slice %0 {offsets = [0, 8], sizes = [16, 1], strides = [1, 1]} : vector<16x9xf32> to vector<16x1xf32>
    %4 = vector.extract_strided_slice %0 {offsets = [0, 1], sizes = [16, 1], strides = [1, 1]} : vector<16x9xf32> to vector<16x1xf32>
    %5 = vector.extract_strided_slice %0 {offsets = [0, 5], sizes = [16, 1], strides = [1, 1]} : vector<16x9xf32> to vector<16x1xf32>
    %6 = vector.extract_strided_slice %0 {offsets = [0, 6], sizes = [16, 1], strides = [1, 1]} : vector<16x9xf32> to vector<16x1xf32>
    %7 = tpu.concatenate %4, %5, %6 in 1 : vector<16x1xf32>, vector<16x1xf32>, vector<16x1xf32> -> vector<16x3xf32>
    %8 = tpu.concatenate %1, %2, %3 in 1 : vector<16x1xf32>, vector<16x1xf32>, vector<16x1xf32> -> vector<16x3xf32>
    %9 = tpu.concatenate %8, %7 in 1 : vector<16x3xf32>, vector<16x3xf32> -> vector<16x6xf32>
    %c0_1 = arith.constant 0 : index
    %c0_2 = arith.constant 0 : index
    %10 = vector.load %arg2[%c0_1, %c0_2] : memref<16x6xf32, #tpu.memory_space<vmem>>, vector<16x6xf32>
    tpu.vector_store %arg2[%c0_1, %c0_2], %9 {strides = array<i32>} : memref<16x6xf32, #tpu.memory_space<vmem>>, vector<16x6xf32>,
    return
  }
  func.func @transform_0(%arg0: i32) -> (i32, i32) {
    %c0_i32 = arith.constant 0 : i32
    %c0_i32_0 = arith.constant 0 : i32
    return %arg0, %c0_i32 : i32, i32
  }
  func.func @transform_1(%arg0: i32) -> (i32, i32) {
    %c0_i32 = arith.constant 0 : i32
    %c0_i32_0 = arith.constant 0 : i32
    return %arg0, %c0_i32 : i32, i32
  }
}

</mosaic_0001>

<bundles_post_ra>
// kernel: tpu_custom_call.1
= control target key start
LH: loop header
LB: loop body
LE: loop exit
PB: predicated region body
PF: predicated region fallthrough
CT: control target
= control target key end

     0   :  { %s275_s6 = smov 0   ;;  %s307_s0 = inlined_call_operand.vmem [shape: f32[128,9], index: 0, kind: input, shape index: {}]   ;;  %s308_s1 = inlined_call_operand.vmem [shape: f32[128,6], index: 1, kind: output, shape index: {}]  }
   0x1 LB: > { %s228_s7 = sadd.s32 4294967295, %s258_s6   ;;  %p232_p0 = scmp.ge.s32.totalorder %s258_s6, 1  ;;  %s258_s6 = sphi %s275_s6, %s11_s6  }
   0x2   : > { %p88_p1 = scmp.lt.s32.totalorder %s258_s6, 9 }
   0x4   : > { %p89_p2 = pnand %p232_p0, %p88_p1 }
   0x5   : > { %s233_s8 = sshll.u32 (!%p89_p2), %s228_s7, 1  ;;  %s260_s13 = smov (!%p89_p2), 124   ;;  %vm136_vm0 = vcmask (!%p89_p2), 7168   ;;  %vm139_vm1 = vcmask (!%p89_p2), 15360   ;;  %vm166_vm2 = vcmask (!%p89_p2), 23552   ;;  %vm169_vm3 = vcmask (!%p89_p2), 48128  }
   0x6   : > { %92 = sbr.rel (%p89_p2) target bundleno = 255 (0xff), region = 24  ;;  %p109_p3 = scmp.lt.s32.totalorder (!%p89_p2), %s233_s8, 15 }
   0x7   : > { %s261_s14 = smov (!%p89_p2), 127   ;;  %s262_s15 = smov (!%p89_p2), 125  }
   0x8   : > { %s263_s16 = smov (!%p89_p2), 122   ;;  %s264_s17 = smov (!%p89_p2), 3  }
   0xd   : > { %s310_s8 = smov (!%p109_p3, %s233_s8), 15 }
   0xe   : > { %s234_s9 = sshll.u32 %s310_s8, 3 }
   0xf   : > { %s112_s12 = scalar_lea.vmem %s307_s0, %s234_s9  ;;  %s118_s20 = scalar_lea.vmem %s308_s1, %s234_s9 }
  0x10   : > { %v120_v0 = vld [vmem:[%s112_s12] sm:$0xff]  ;;  %v121_v1 = vld [vmem:[%s112_s12 + $0x8] sm:$0xff] }
  0x11   : > { %130 = vrot.lane.b32.xlu1 %v120_v0, %s260_s13  ;;  %124 = vrot.lane.b32.xlu0 %v120_v0, %s261_s14 }
  0x15   : > { %132 = vrot.lane.b32.xlu1 %v121_v1, %s260_s13  ;;  %126 = vrot.lane.b32.xlu0 %v121_v1, %s261_s14 }
  0x19   : > { %142 = vrot.lane.b32.xlu0 %v120_v0, %s262_s15  ;;  %144 = vrot.lane.b32.xlu1 %v121_v1, %s262_s15 }
  0x1d   : > { %148 = vrot.lane.b32.xlu0 %v120_v0, %s263_s16  ;;  %150 = vrot.lane.b32.xlu1 %v121_v1, %s263_s16 }
  0x83   : > { %v131_v2 = vpop.permute.xlu1 %130  ;;  %v125_v3 = vpop.permute.xlu0 %124 }
  0x84   : > { %v137_v4 = vsel %vm136_vm0, %v125_v3, %v131_v2 }
  0x85   : > { %v140_v5 = vsel %vm139_vm1, %v137_v4, %v131_v2 }
  0x86   : > { %160 = vrot.lane.b32.xlu0 %v140_v5, %s264_s17 }
  0x87   : > { %v133_v6 = vpop.permute.xlu1 %132  ;;  %v127_v7 = vpop.permute.xlu0 %126 }
  0x88   : > { %v138_v8 = vsel %vm136_vm0, %v127_v7, %v133_v6 }
  0x89   : > { %v141_v9 = vsel %vm139_vm1, %v138_v8, %v133_v6 }
  0x8a   : > { %162 = vrot.lane.b32.xlu1 %v141_v9, %s264_s17 }
  0x8b   : > { %v143_v10 = vpop.permute.xlu0 %142  ;;  %v145_v11 = vpop.permute.xlu1 %144 }
  0x8c   : > { %v154_v12 = vsel %vm136_vm0, %v120_v0, %v143_v10  ;;  %v155_v13 = vsel %vm136_vm0, %v121_v1, %v145_v11 }
  0x8f   : > { %v149_v14 = vpop.permute.xlu0 %148  ;;  %v151_v15 = vpop.permute.xlu1 %150 }
  0x90   : > { %v156_v16 = vsel %vm139_vm1, %v154_v12, %v149_v14  ;;  %v157_v17 = vsel %vm139_vm1, %v155_v13, %v151_v15 }
  0xf8   : > { %v161_v18 = vpop.permute.xlu0 %160 }
  0xf9   : > { %v167_v19 = vsel %vm166_vm2, %v156_v16, %v161_v18 }
  0xfa   : > { %170 = vst.msk [vmem:[%s118_s20] sm:$0xff] %vm169_vm3, %v167_v19 }
  0xfc   : > { %v163_v20 = vpop.permute.xlu1 %162 }
  0xfd   : > { %v168_v21 = vsel %vm166_vm2, %v157_v17, %v163_v20 }
  0xfe   : > { %171 = vst.msk [vmem:[%s118_s20 + $0x8] sm:$0xff] %vm169_vm3, %v168_v21 }
  0xff PF: > { %s11_s6 = sadd.s32 1, %s258_s6  }
 0x100   : > { %p8_p4 = scmp.ge.s32.totalorder %s11_s6, 10  }
 0x102   :  { %10 = sbr.rel (!%p8_p4) target bundleno = 1 (0x1), region = 54 }

</bundles_post_ra>
